<compile_context>
chip_gen: v6e
topology: v6e:2x2x1
jax: 0.10.0
libtpu: 0.0.40
codegen_flags: <defaults>
</compile_context>

<pallas_src>
import functools

import jax
import jax.numpy as jnp
from jax.experimental import pallas as pl
from jax.experimental.pallas import tpu as pltpu


def _round_up(n: int, m: int) -> int:
    return ((n + m - 1) // m) * m


def _quantile_tok_kernel(xk_ref, bnd_ref, dtbl_ref, base_ref, o_ref, *, inv_f):
    """One batch tile.

    xk_ref   : (TB, K_pad)    f32   x replicated over q:  xk[b, q*F+f] = x[b, f]
    bnd_ref  : (1,  K_pad)    f32   boundaries flat:       bnd[0, q*F+f] = boundaries[f, q]
    dtbl_ref : (K_pad, E_pad) f32/bf16  delta table:       dtbl[q*F+f] = tbl[q+1,f]-tbl[q,f]
    base_ref : (1,  E_pad)    f32   sum_f tbl[0, f, :]
    o_ref    : (TB, E_pad)    f32
    """
    # Lane-dense step mask (0/1 exact in any float dtype), one VPU compare.
    steps = (bnd_ref[...] < xk_ref[...]).astype(dtbl_ref.dtype)        # (TB, K_pad)
    # Single fat-K MXU matmul with f32 accumulation.
    acc = jnp.dot(steps, dtbl_ref[...],
                  preferred_element_type=jnp.float32)                  # (TB, E_pad) f32
    # Add precomputed base and apply the 1/F mean scale on the f32 result;
    # single lane-dense store to the output tile.
    o_ref[...] = (acc + base_ref[...]) * jnp.float32(inv_f)


def prepare_quantile_tokenization(boundaries, emb_table, *,
                                  compute_dtype=jnp.bfloat16):
    """One-time weight repack (cache this at model init, not per forward call).

    boundaries: (F, Q) fitted, sorted per-feature boundaries.
    emb_table:  (V, E) with V = F*Q + 2 (row 0 reserved for the masking token).
    Returns (bnd_flat, dtbl, base, meta) ready for the kernel.
    """
    F, Q = boundaries.shape
    V, E = emb_table.shape
    assert V == F * Q + 2, "emb_table rows must be f_num*q_num + 2"

    K = Q * F
    K_pad = _round_up(max(K, 1), 128)
    E_pad = _round_up(E, 128)

    emb = emb_table.astype(jnp.float32)
    # tbl[q, f, :] = emb[f*Q + q + 1, :]   (bucket q for feature f; bucket==Q reachable)
    row_ids = (jnp.arange(Q + 1, dtype=jnp.int32)[:, None]
               + jnp.arange(F, dtype=jnp.int32)[None, :] * Q + 1)        # (Q+1, F)
    tbl = emb[row_ids]                                                   # (Q+1, F, E) f32
    dtbl = (tbl[1:] - tbl[:-1]).reshape(K, E)                            # (Q*F, E)    f32
    base = jnp.sum(tbl[0], axis=0).reshape(1, E)                         # (1, E)      f32

    # Pad to lane-dense shapes; delta table optionally cast to bf16 (base stays f32).
    dtbl = jnp.pad(dtbl, ((0, K_pad - K), (0, E_pad - E))).astype(compute_dtype)
    base = jnp.pad(base, ((0, 0), (0, E_pad - E)))

    # bnd_flat[0, q*F + f] = boundaries[f, q];  padded columns = +inf (never fire).
    bnd_flat = jnp.transpose(boundaries.astype(jnp.float32)).reshape(1, K)
    bnd_flat = jnp.pad(bnd_flat, ((0, 0), (0, K_pad - K)),
                       constant_values=float("inf"))

    meta = dict(q_num=int(Q), f_num=int(F), emb_dim=int(E),
                k_pad=int(K_pad), e_pad=int(E_pad))
    return bnd_flat, dtbl, base, meta


def quantile_tokenization_mean_apply(x, prepared, *, block_b=256,
                                     single_buffer_constants=True):
    """QuantileTokenization forward (mode='mean', eval; dropout/masking off)."""
    bnd_flat, dtbl, base, meta = prepared
    Q, F, E = meta["q_num"], meta["f_num"], meta["emb_dim"]
    K_pad, E_pad = meta["k_pad"], meta["e_pad"]

    orig_shape = x.shape
    if x.ndim == 3:
        x = x.reshape(-1, x.shape[-1])
    assert x.ndim == 2 and x.shape[-1] == F
    B = x.shape[0]

    # Batch tile: fill the MXU M-dim / amortize the ~0.35 us per-step overhead,
    # but keep the batch grid >= 2 steps when the batch allows it so a dual-TC
    # chip (v7x) can shard the "parallel" axis across both cores.
    b8 = _round_up(B, 8)
    block_b = max(8, min(int(block_b), b8))
    if b8 >= 16:
        block_b = min(block_b, _round_up(b8 // 2, 8))
    B_pad = _round_up(B, block_b)

    x_f32 = x.astype(jnp.float32)
    if B_pad != B:
        x_f32 = jnp.pad(x_f32, ((0, B_pad - B), (0, 0)))
    # Lane-dense K layout (layout plumbing only): x_k[b, q*F + f] = x[b, f].
    x_k = jnp.tile(x_f32, (1, Q))
    if K_pad != Q * F:
        x_k = jnp.pad(x_k, ((0, 0), (0, K_pad - Q * F)))

    # VMEM budget: ~75% of physical, capped at 96 MiB (=> ~96 MiB v5e/v6e, ~48 MiB v7x).
    try:
        phys_vmem = int(pltpu.get_tpu_info().vmem_capacity_bytes)
    except Exception:
        phys_vmem = 64 * 1024 * 1024
    vmem_limit = max(32 * 1024 * 1024, min(96 * 1024 * 1024, (phys_vmem * 3) // 4))

    itemsize = jnp.dtype(dtbl.dtype).itemsize
    cost = pl.CostEstimate(
        flops=2 * B_pad * K_pad * E_pad + 2 * B_pad * E_pad,
        transcendentals=0,
        bytes_accessed=(B_pad * K_pad * 4 + K_pad * 4
                        + K_pad * E_pad * itemsize + E_pad * 4
                        + B_pad * E_pad * 4),
    )

    kernel = functools.partial(_quantile_tok_kernel, inv_f=1.0 / F)
    grid = (B_pad // block_b,)

    # TODO(synk): for very large F*Q*E the delta table should be tiled over an
    # extra K grid axis (f32 VMEM scratch accumulator) instead of kept resident.
    def build(single_buffer):
        def const_spec(shape):
            zero_map = (lambda i, _n=len(shape): (0,) * _n)
            if single_buffer:
                return pl.BlockSpec(shape, zero_map, pipeline_mode=pl.Buffered(1))
            return pl.BlockSpec(shape, zero_map)

        return pl.pallas_call(
            kernel,
            out_shape=jax.ShapeDtypeStruct((B_pad, E_pad), jnp.float32),
            grid_spec=pltpu.PrefetchScalarGridSpec(
                num_scalar_prefetch=0,
                grid=grid,
                in_specs=[
                    pl.BlockSpec((block_b, K_pad), lambda i: (i, 0)),   # x slab
                    const_spec((1, K_pad)),                             # boundaries (flat)
                    const_spec((K_pad, E_pad)),                         # delta table
                    const_spec((1, E_pad)),                             # base row
                ],
                out_specs=pl.BlockSpec((block_b, E_pad), lambda i: (i, 0)),
            ),
            compiler_params=pltpu.CompilerParams(
                dimension_semantics=("parallel",),
                vmem_limit_bytes=vmem_limit,
            ),
            cost_estimate=cost,
        )

    if single_buffer_constants:
        try:
            out = build(True)(x_k, bnd_flat, dtbl, base)
        except Exception:
            # pipeline_mode=pl.Buffered(1) not supported in this JAX build;
            # fall back to default double-buffered specs (correctness identical).
            out = build(False)(x_k, bnd_flat, dtbl, base)
    else:
        out = build(False)(x_k, bnd_flat, dtbl, base)

    out = out[:B, :E]
    if len(orig_shape) == 3:
        out = out.reshape(orig_shape[0], orig_shape[1], E)
    return out


def quantile_tokenization_mean(x, boundaries, emb_table, *,
                               compute_dtype=jnp.bfloat16, block_b=256,
                               single_buffer_constants=True):
    """Convenience one-shot wrapper (prefer caching prepare_* at model init)."""
    prepared = prepare_quantile_tokenization(boundaries, emb_table,
                                             compute_dtype=compute_dtype)
    return quantile_tokenization_mean_apply(x, prepared, block_b=block_b,
                                            single_buffer_constants=single_buffer_constants)


def _reference(x, boundaries, emb_table):
    """Pure-JAX reference mirroring the PyTorch forward (mode='mean', eval)."""
    B, F = x.shape
    Q = boundaries.shape[1]
    buckets = jnp.sum(boundaries[None, :, :] < x[:, :, None], axis=-1)   # (B, F)
    tokens = buckets + jnp.arange(F, dtype=jnp.int32)[None, :] * Q + 1   # (B, F)
    return jnp.mean(emb_table[tokens], axis=-2)                          # (B, E)


if __name__ == "__main__":
    # Small deterministic setup consistent with the module:
    #   q_num=8, f_num=4, embedding_dim=32, mode='mean', 2-D input (B, F)
    q_num, f_num, embedding_dim = 8, 4, 32
    vocab = q_num * f_num + 2   # max_token_id + 1
    B = 16

    key = jax.random.PRNGKey(0)
    kx, kb, ke = jax.random.split(key, 3)

    x = jax.random.normal(kx, (B, f_num), dtype=jnp.float32)
    # "fit()" surrogate: sorted per-feature boundaries (quantile-like, ascending)
    boundaries = jnp.sort(
        jax.random.normal(kb, (f_num, q_num), dtype=jnp.float32), axis=-1)
    # nn.Embedding default init ~ N(0, 1); row 0 reserved for the masking token.
    emb_table = jax.random.normal(ke, (vocab, embedding_dim), dtype=jnp.float32)

    ref = _reference(x, boundaries, emb_table)

    # Exact path (f32 delta table): faithful to the gather+mean semantics.
    prep_f32 = prepare_quantile_tokenization(boundaries, emb_table,
                                             compute_dtype=jnp.float32)
    out_f32 = jax.block_until_ready(quantile_tokenization_mean_apply(x, prep_f32))
    assert out_f32.shape == (B, embedding_dim)
    assert jnp.allclose(out_f32, ref, atol=1e-5, rtol=1e-5), "f32 path mismatch vs reference"

    # Fast path (bf16 delta table): 0/1 mask is exact, only the table rounds.
    prep_bf16 = prepare_quantile_tokenization(boundaries, emb_table,
                                              compute_dtype=jnp.bfloat16)
    out_bf16 = jax.block_until_ready(quantile_tokenization_mean_apply(x, prep_bf16))
    assert out_bf16.shape == (B, embedding_dim)
    assert jnp.allclose(out_bf16, ref, atol=1e-1), "bf16 path drifted vs reference"

    # TODO(synk): training-time TokenMasking / Dropout (stochastic) and the
    # 'sum'/'flatten'/'none' modes, plus nn.Embedding max_norm renorm, are
    # intentionally omitted — eval-mode 'mean' forward only.
    print("KERNEL_OK")
</pallas_src>

<mosaic_0001>
module attributes {stable_mosaic.version = 11 : i64} {
  func.func @_quantile_tok_kernel(%arg0: i32, %arg1: memref<8x128xf32, #tpu.memory_space<vmem>>, %arg2: memref<1x128xf32, #tpu.memory_space<vmem>>, %arg3: memref<128x128xf32, #tpu.memory_space<vmem>>, %arg4: memref<1x128xf32, #tpu.memory_space<vmem>>, %arg5: memref<8x128xf32, #tpu.memory_space<vmem>>) attributes {dimension_semantics = [#tpu.dimension_semantics<parallel>], iteration_bounds = array<i64: 2>, scalar_prefetch = 0 : i64, scratch_operands = 0 : i64, tpu.core_type = #tpu.core_type<tc>, window_params = [{transform_indices = @transform_0, window_bounds = array<i64: 8, 128>}, {pipeline_mode = #tpu.pipeline_mode<synchronous>, transform_indices = @transform_1, window_bounds = array<i64: 1, 128>}, {pipeline_mode = #tpu.pipeline_mode<synchronous>, transform_indices = @transform_2, window_bounds = array<i64: 128, 128>}, {pipeline_mode = #tpu.pipeline_mode<synchronous>, transform_indices = @transform_3, window_bounds = array<i64: 1, 128>}, {transform_indices = @transform_4, window_bounds = array<i64: 8, 128>}]} {
    %c0 = arith.constant 0 : index
    %c0_0 = arith.constant 0 : index
    %0 = vector.load %arg2[%c0, %c0_0] : memref<1x128xf32, #tpu.memory_space<vmem>>, vector<1x128xf32>
    %c0_1 = arith.constant 0 : index
    %c0_2 = arith.constant 0 : index
    %1 = vector.load %arg1[%c0_1, %c0_2] : memref<8x128xf32, #tpu.memory_space<vmem>>, vector<8x128xf32>
    %2 = vector.broadcast %0 : vector<1x128xf32> to vector<8x128xf32>
    %3 = arith.cmpf olt, %2, %1 : vector<8x128xf32>
    %4 = arith.extui %3 : vector<8x128xi1> to vector<8x128xi32>
    %5 = arith.sitofp %4 : vector<8x128xi32> to vector<8x128xf32>
    %c0_3 = arith.constant 0 : index
    %c0_4 = arith.constant 0 : index
    %6 = vector.load %arg3[%c0_3, %c0_4] : memref<128x128xf32, #tpu.memory_space<vmem>>, vector<128x128xf32>
    %cst = arith.constant dense<0.000000e+00> : vector<8x128xf32>
    %7 = tpu.matmul %5, %6, %cst {dimension_numbers = #tpu.dot_dimension_numbers<[1], [0], [0], [1], [0, 0, 1, 1], [], []>} : vector<8x128xf32>, vector<128x128xf32>, vector<8x128xf32> -> vector<8x128xf32>
    %c0_5 = arith.constant 0 : index
    %c0_6 = arith.constant 0 : index
    %8 = vector.load %arg4[%c0_5, %c0_6] : memref<1x128xf32, #tpu.memory_space<vmem>>, vector<1x128xf32>
    %9 = vector.broadcast %8 : vector<1x128xf32> to vector<8x128xf32>
    %10 = arith.addf %7, %9 : vector<8x128xf32>
    %cst_7 = arith.constant 2.500000e-01 : f32
    %11 = vector.broadcast %cst_7 : f32 to vector<8x128xf32>
    %12 = arith.mulf %10, %11 : vector<8x128xf32>
    %c0_8 = arith.constant 0 : index
    %c0_9 = arith.constant 0 : index
    %13 = vector.load %arg5[%c0_8, %c0_9] : memref<8x128xf32, #tpu.memory_space<vmem>>, vector<8x128xf32>
    tpu.vector_store %arg5[%c0_8, %c0_9], %12 {strides = array<i32>} : memref<8x128xf32, #tpu.memory_space<vmem>>, vector<8x128xf32>,
    return
  }
  func.func @transform_0(%arg0: i32) -> (i32, i32) {
    %c0_i32 = arith.constant 0 : i32
    %c0_i32_0 = arith.constant 0 : i32
    return %arg0, %c0_i32 : i32, i32
  }
  func.func @transform_1(%arg0: i32) -> (i32, i32) {
    %c0_i32 = arith.constant 0 : i32
    %c0_i32_0 = arith.constant 0 : i32
    %c0_i32_1 = arith.constant 0 : i32
    return %c0_i32, %c0_i32_0 : i32, i32
  }
  func.func @transform_2(%arg0: i32) -> (i32, i32) {
    %c0_i32 = arith.constant 0 : i32
    %c0_i32_0 = arith.constant 0 : i32
    %c0_i32_1 = arith.constant 0 : i32
    return %c0_i32, %c0_i32_0 : i32, i32
  }
  func.func @transform_3(%arg0: i32) -> (i32, i32) {
    %c0_i32 = arith.constant 0 : i32
    %c0_i32_0 = arith.constant 0 : i32
    %c0_i32_1 = arith.constant 0 : i32
    return %c0_i32, %c0_i32_0 : i32, i32
  }
  func.func @transform_4(%arg0: i32) -> (i32, i32) {
    %c0_i32 = arith.constant 0 : i32
    %c0_i32_0 = arith.constant 0 : i32
    return %arg0, %c0_i32 : i32, i32
  }
}

module attributes {stable_mosaic.version = 11 : i64} {
  func.func @_quantile_tok_kernel(%arg0: i32, %arg1: memref<8x128xf32, #tpu.memory_space<vmem>>, %arg2: memref<1x128xf32, #tpu.memory_space<vmem>>, %arg3: memref<128x128xf32, #tpu.memory_space<vmem>>, %arg4: memref<1x128xf32, #tpu.memory_space<vmem>>, %arg5: memref<8x128xf32, #tpu.memory_space<vmem>>) attributes {dimension_semantics = [#tpu.dimension_semantics<parallel>], iteration_bounds = array<i64: 2>, scalar_prefetch = 0 : i64, scratch_operands = 0 : i64, tpu.core_type = #tpu.core_type<tc>, window_params = [{transform_indices = @transform_0, window_bounds = array<i64: 8, 128>}, {pipeline_mode = #tpu.pipeline_mode<synchronous>, transform_indices = @transform_1, window_bounds = array<i64: 1, 128>}, {pipeline_mode = #tpu.pipeline_mode<synchronous>, transform_indices = @transform_2, window_bounds = array<i64: 128, 128>}, {pipeline_mode = #tpu.pipeline_mode<synchronous>, transform_indices = @transform_3, window_bounds = array<i64: 1, 128>}, {transform_indices = @transform_4, window_bounds = array<i64: 8, 128>}]} {
    %c0 = arith.constant 0 : index
    %c0_0 = arith.constant 0 : index
    %0 = vector.load %arg2[%c0, %c0_0] : memref<1x128xf32, #tpu.memory_space<vmem>>, vector<1x128xf32>
    %c0_1 = arith.constant 0 : index
    %c0_2 = arith.constant 0 : index
    %1 = vector.load %arg1[%c0_1, %c0_2] : memref<8x128xf32, #tpu.memory_space<vmem>>, vector<8x128xf32>
    %2 = vector.broadcast %0 : vector<1x128xf32> to vector<8x128xf32>
    %3 = arith.cmpf olt, %2, %1 : vector<8x128xf32>
    %4 = arith.extui %3 : vector<8x128xi1> to vector<8x128xi32>
    %5 = arith.sitofp %4 : vector<8x128xi32> to vector<8x128xf32>
    %c0_3 = arith.constant 0 : index
    %c0_4 = arith.constant 0 : index
    %6 = vector.load %arg3[%c0_3, %c0_4] : memref<128x128xf32, #tpu.memory_space<vmem>>, vector<128x128xf32>
    %cst = arith.constant dense<0.000000e+00> : vector<8x128xf32>
    %7 = tpu.matmul %5, %6, %cst {dimension_numbers = #tpu.dot_dimension_numbers<[1], [0], [0], [1], [0, 0, 1, 1], [], []>} : vector<8x128xf32>, vector<128x128xf32>, vector<8x128xf32> -> vector<8x128xf32>
    %c0_5 = arith.constant 0 : index
    %c0_6 = arith.constant 0 : index
    %8 = vector.load %arg4[%c0_5, %c0_6] : memref<1x128xf32, #tpu.memory_space<vmem>>, vector<1x128xf32>
    %9 = vector.broadcast %8 : vector<1x128xf32> to vector<8x128xf32>
    %10 = arith.addf %7, %9 : vector<8x128xf32>
    %cst_7 = arith.constant 2.500000e-01 : f32
    %11 = vector.broadcast %cst_7 : f32 to vector<8x128xf32>
    %12 = arith.mulf %10, %11 : vector<8x128xf32>
    %c0_8 = arith.constant 0 : index
    %c0_9 = arith.constant 0 : index
    %13 = vector.load %arg5[%c0_8, %c0_9] : memref<8x128xf32, #tpu.memory_space<vmem>>, vector<8x128xf32>
    tpu.vector_store %arg5[%c0_8, %c0_9], %12 {strides = array<i32>} : memref<8x128xf32, #tpu.memory_space<vmem>>, vector<8x128xf32>,
    return
  }
  func.func @transform_0(%arg0: i32) -> (i32, i32) {
    %c0_i32 = arith.constant 0 : i32
    %c0_i32_0 = arith.constant 0 : i32
    return %arg0, %c0_i32 : i32, i32
  }
  func.func @transform_1(%arg0: i32) -> (i32, i32) {
    %c0_i32 = arith.constant 0 : i32
    %c0_i32_0 = arith.constant 0 : i32
    %c0_i32_1 = arith.constant 0 : i32
    return %c0_i32, %c0_i32_0 : i32, i32
  }
  func.func @transform_2(%arg0: i32) -> (i32, i32) {
    %c0_i32 = arith.constant 0 : i32
    %c0_i32_0 = arith.constant 0 : i32
    %c0_i32_1 = arith.constant 0 : i32
    return %c0_i32, %c0_i32_0 : i32, i32
  }
  func.func @transform_3(%arg0: i32) -> (i32, i32) {
    %c0_i32 = arith.constant 0 : i32
    %c0_i32_0 = arith.constant 0 : i32
    %c0_i32_1 = arith.constant 0 : i32
    return %c0_i32, %c0_i32_0 : i32, i32
  }
  func.func @transform_4(%arg0: i32) -> (i32, i32) {
    %c0_i32 = arith.constant 0 : i32
    %c0_i32_0 = arith.constant 0 : i32
    return %arg0, %c0_i32 : i32, i32
  }
}

</mosaic_0001>

<bundles_post_ra>
// kernel: tpu_custom_call.1
= control target key start
LH: loop header
LB: loop body
LE: loop exit
PB: predicated region body
PF: predicated region fallthrough
CT: control target
= control target key end

     0   :  { %9 = vsyncpa [#allocation3], 0  ;;  %s884_s0 = inlined_call_operand.hbm [shape: f32[16,128], index: 0, kind: input, shape index: {}]   ;;  %s885_s1 = inlined_call_operand.vmem [shape: f32[1,128], index: 1, kind: input, shape index: {}]   ;;  %s886_s2 = inlined_call_operand.hbm [shape: f32[128,128], index: 2, kind: input, shape index: {}]   ;;  %s887_s3 = inlined_call_operand.vmem [shape: f32[1,128], index: 3, kind: input, shape index: {}]   ;;  %s888_s4 = inlined_call_operand.hbm [shape: f32[16,128], index: 4, kind: output, shape index: {}]  }
   0x1   :  { %11 = vsyncpa [#allocation3 + $0x1], 0 }
   0x2   :  { %12 = vsyncpa [#allocation6], 0 }
   0x3   :  { %13 = vsyncpa [#allocation4], 0 }
   0x4   :  { %15 = vsyncpa [#allocation4 + $0x1], 0  ;;  %s717_s15 = smov 0   ;;  %s719_s16 = smov 0  }
   0x5   :  { %s721_s17 = smov 0   ;;  %s723_s18 = smov 0  }
   0x6 LB: > { %s738_s19 = sadd.s32 4294967295, %s682_s18   ;;  %s428_s20 = sadd.s32 4294967294, %s682_s18   ;;  %s682_s18 = sphi %s723_s18, %s910_s18   ;;  %s678_s17 = sphi %s721_s17, %s909_s17   ;;  %s674_s16 = sphi %s719_s16, %s908_s16   ;;  %s670_s15 = sphi %s717_s15, %s907_s15  }
   0x7   : > { %p41_p0 = scmp.ne.s32.totalorder %s674_s16, %s670_s15  ;;  %p889_p1 = scmp.eq.s32.totalorder %s738_s19, 0 }
   0x8   : > { %p134_p3 = scmp.eq.s32.totalorder %s428_s20, 1  ;;  %p429_p5 = scmp.ge.s32.totalorder %s682_s18, 1 }
   0x9   : > { %p747_p4 = por %p889_p1, %p41_p0  ;;  %p141_p7 = scmp.lt.s32.totalorder %s682_s18, 3 }
   0xa   : > { %p752_p6 = por %p134_p3, %p41_p0  ;;  %s684_s24 = smov [#allocation5]  }
   0xb   : > { %s893_s21 = scalar_select %p747_p4, 1, 0 }
   0xc   : > { %s894_s22 = scalar_select %p752_p6, 1, 0 }
   0xd   : > { %p757_p8 = pnand %p429_p5, %p141_p7  ;;  %s156_s25 = sshll.u32 %s684_s24, 4  ;;  %s157_s25 = int_to_ptr.vmem [resolvable:$true] %s156_s25 }
   0xe   : > { %s771_s27 = sadd.s32 1, %s682_s18   ;;  %s28_s28 = sadd.s32 1, %s678_s17 }
   0xf   : > { %s895_s23 = scalar_select %p757_p8, 1, 0 }
  0x10   : > { %p506_p9 = pneg %p757_p8  ;;  %s25_s29 = ssub.s32 %s682_s18, %s771_s27 }
  0x11   : > { %s571_s30 = scalar_lea.vmem %s157_s25, 2048  ;;  %p579_p5 = scmp.lt.s32.totalorder %s157_s25, %s157_s25 }
  0x12   : > { %p766_p11 = pnand %p506_p9, %p889_p1  ;;  %p572_p13 = scmp.ne.s32.totalorder %s157_s25, %s571_s30 }
  0x13   : > { %p580_p7 = scmp.lt.s32.totalorder %s571_s30, %s571_s30 }
  0x14   : > { %p562_p12 = pneg %p766_p11 }
  0x15   : > { %p581_p10 = por %p580_p7, %p579_p5 }
  0x16   : > { %p574_p0 = pnand %p572_p13, %p562_p12 }
  0x18   : > { %p575_p3 = pneg %p574_p0 }
  0x1a   : > { %p582_p2 = pnand %p581_p10, %p575_p3 }
  0x1c   : > { %585 = shalt.err (!%p582_p2)
}
  0x1d   : > { %s685_s5 = smov 128   ;;  %s686_s6 = smov 8  }
  0x1e   : > { %509 = dma.hbm_to_vmem [thread:$0]  (!%p766_p11), %s886_s2, 2048, %s157_s25, [#allocation6], %s685_s5, %s685_s5, %s686_s6  }
  0x1f   : > { %p26_p9 = scmp.eq.s32.totalorder %s25_s29, 0  ;;  %p35_p12 = scmp.ne.s32.totalorder %s678_s17, %s674_s16 }
  0x20   : > { %p36_p10 = scmp.eq.s32.totalorder %s682_s18, 0  ;;  %p519_p2 = scmp.lt.s32.totalorder %s682_s18, 2 }
  0x21   : > { %s788_s9 = scalar_select %p26_p9, %s678_s17, %s28_s28  }
  0x22   : > { %p37_p13 = por %p36_p10, %p35_p12  ;;  %p897_p0 = scmp.eq.s32.totalorder %s738_s19, 1 }
  0x23   : > { %s173_s11 = sand.u32 1, %s678_s17   ;;  %s433_s12 = sshll.u32 %s682_s18, 7 }
  0x24   : > { %p792_p3 = por %p897_p0, %p35_p12  ;;  %s432_s13 = sshll.u32 %s173_s11, 3 }
  0x25   : > { %s801_s24 = scalar_lea.hbm %s884_s0, %s433_s12  ;;  %s177_s25 = scalar_lea.vmem [#allocation2], %s432_s13 }
  0x26   : > { %s898_s10 = scalar_select %p792_p3, 1, 0 }
  0x27   : > { %s184_s26 = sshll.u32 %s177_s25, 4  ;;  %p803_p11 = pnand %p519_p2, %p37_p13  ;;  %s185_s26 = int_to_ptr.vmem [resolvable:$true] %s184_s26 }
  0x28   : > { %s174_s29 = scalar_lea.sflag [#allocation3], %s173_s11  ;;  %s586_s30 = scalar_lea.hbm %s801_s24, 128 }
  0x29   : > { %p587_p5 = scmp.ne.s32.totalorder %s801_s24, %s586_s30  ;;  %p588_p7 = pneg %p803_p11 }
  0x2a   : > { %s591_s7 = scalar_lea.hbm %s884_s0, 256  ;;  %p592_p10 = scmp.lt.s32.totalorder %s801_s24, %s884_s0 }
  0x2b   : > { %p589_p9 = pnand %p588_p7, %p587_p5  ;;  %p593_p2 = scmp.lt.s32.totalorder %s591_s7, %s586_s30 }
  0x2d   : > { %p590_p12 = pneg %p589_p9  ;;  %p594_p13 = por %p593_p2, %p592_p10 }
  0x2f   : > { %p595_p0 = pnand %p594_p13, %p590_p12 }
  0x31   : > { %598 = shalt.err (!%p595_p0)
}
  0x32   : > { %s599_s13 = scalar_lea.vmem %s185_s26, 128  ;;  %s687_s11 = smov [#allocation2]  }
  0x33   : > { %p600_p1 = scmp.ne.s32.totalorder %s185_s26, %s599_s13  ;;  %s604_s14 = sshll.u32 %s687_s11, 4  ;;  %s605_s14 = int_to_ptr.vmem [resolvable:$false] %s604_s14 }
  0x34   : > { %s606_s20 = scalar_lea.vmem %s605_s14, 256  ;;  %p607_p5 = scmp.lt.s32.totalorder %s185_s26, %s605_s14 }
  0x35   : > { %p602_p6 = pnand %p600_p1, %p588_p7  ;;  %p608_p9 = scmp.lt.s32.totalorder %s606_s20, %s599_s13 }
  0x37   : > { %p603_p3 = pneg %p602_p6  ;;  %p609_p4 = por %p608_p9, %p607_p5 }
  0x39   : > { %p610_p8 = pnand %p609_p4, %p603_p3 }
  0x3b   : > { %613 = shalt.err (!%p610_p8)
}
  0x3c   : > { %513 = dma.hbm_to_vmem [thread:$0]  (!%p803_p11), %s801_s24, 128, %s185_s26, %s174_s29  }
  0x3d   : > { %p900_p12 = scmp.ne.s32.totalorder %s895_s23, 0 }
  0x3e   : > { %s824_s25 = sand.u32 (!%p900_p12), 1, %s674_s16   ;;  %p901_p1 = scmp.ne.s32.totalorder (!%p900_p12), %s893_s21, 0 }
  0x3f   : > { %193 = sbr.rel (%p900_p12) target bundleno = 315 (0x13b), region = 36  ;;  %s435_s30 = sshll.u32 (!%p900_p12), %s824_s25, 3 }
  0x40   : > { %s196_s5 = scalar_lea.sflag (!%p900_p12), [#allocation3], %s824_s25  ;;  %s830_s6 = scalar_lea.vmem (!%p900_p12), [#allocation2], %s435_s30 }
  0x44   : > { %657 = dma.done.wait (%p901_p1), %s196_s5, 128  }
  0x45   : > { %659 = vsyncadd (%p901_p1), %s196_s5, 4294967168  ;;  %p902_p4 = scmp.eq.s32.totalorder %s738_s19, 0 }
  0x47   : > { %661 = dma.done.wait (%p902_p4), [#allocation6], 2048   ;;  %p903_p6 = pmov %p902_p4 }
  0x48   : > { %v688_v0 = vmov 0.0   ;;  %vm689_vm0 = vmmov 0   ;;  %v254_v1 = vld [vmem:[#allocation5 + $0x78] sm:$0xff]  ;;  %v253_v2 = vld [vmem:[#allocation5 + $0x70] sm:$0xff]  ;;  %v252_v3 = vld [vmem:[#allocation5 + $0x68] sm:$0xff]  ;;  %v690_v19 = vmov 1.0  }
  0x49   : > { %663 = vsyncadd (%p903_p6), [#allocation6], 4294965248  ;;  %463 = vmatprep.subr.mxu0 %v688_v0  ;;  %495 = vmatprep.mubr.msk.f32.mxu0 %vm689_vm0, %v688_v0  ;;  %v251_v4 = vld [vmem:[#allocation5 + $0x60] sm:$0xff]  ;;  %v250_v5 = vld [vmem:[#allocation5 + $0x58] sm:$0xff]  ;;  %s443_s28 = sshll.u32 %s738_s19, 7  ;;  %s227_s29 = scalar_lea.vmem [#allocation7], %s435_s30 }
  0x4a   : > { %464 = vmatpush3.msra.mxu0 %v254_v1  ;;  %v249_v6 = vld [vmem:[#allocation5 + $0x50] sm:$0xff]  ;;  %v248_v7 = vld [vmem:[#allocation5 + $0x48] sm:$0xff]  ;;  %v247_v8 = vld [vmem:[#allocation5 + $0x40] sm:$0xff]  ;;  %s348_s7 = sshll.u32 %s227_s29, 4  ;;  %s346_s13 = scalar_lea.hbm %s888_s4, %s443_s28  ;;  %s349_s7 = int_to_ptr.vmem [resolvable:$true] %s348_s7 }
  0x4b   : > { %465 = vmatprep.subr.mxu0 %v688_v0  ;;  %v246_v9 = vld [vmem:[#allocation5 + $0x38] sm:$0xff]  ;;  %v245_v10 = vld [vmem:[#allocation5 + $0x30] sm:$0xff]  ;;  %v244_v11 = vld [vmem:[#allocation5 + $0x28] sm:$0xff]  ;;  %s335_s11 = scalar_lea.sflag [#allocation4], %s824_s25  ;;  %s614_s14 = scalar_lea.vmem %s349_s7, 128 }
  0x4c   : > { %466 = vmatpush3.msra.mxu0 %v253_v2  ;;  %v243_v12 = vld [vmem:[#allocation5 + $0x20] sm:$0xff]  ;;  %v242_v13 = vld [vmem:[#allocation5 + $0x18] sm:$0xff]  ;;  %v241_v14 = vld [vmem:[#allocation5 + $0x10] sm:$0xff]  ;;  %p615_p8 = scmp.ne.s32.totalorder %s349_s7, %s614_s14  ;;  %p904_p3 = scmp.ne.s32.totalorder %s898_s10, 0 }
  0x4d   : > { %467 = vmatprep.subr.mxu0 %v688_v0  ;;  %v240_v15 = vld [vmem:[#allocation5 + $0x8] sm:$0xff]  ;;  %v438_v16 = vld [vmem:[%s885_s1] ss:$0 sm:$0xff]  ;;  %v239_v18 = vld [vmem:[#allocation5] sm:$0xff]  ;;  %s691_s20 = smov [#allocation7]  }
  0x4e   : > { %468 = vmatpush3.msra.mxu0 %v252_v3  ;;  %v229_v17 = vld [vmem:[%s830_s6] sm:$0xff]  ;;  %p616_p11 = pnand %p615_p8, %p904_p3  ;;  %s618_s19 = sshll.u32 %s691_s20, 4  ;;  %s619_s19 = int_to_ptr.vmem [resolvable:$false] %s618_s19 }
  0x4f   : > { %469 = vmatprep.subr.mxu0 %v688_v0  ;;  %vm236_vm1 = vcmp.lt.f32.partialorder %v438_v16, %v229_v17  ;;  %v440_v20 = vld [vmem:[%s887_s3] ss:$0 sm:$0xff]  ;;  %s620_s30 = scalar_lea.vmem %s619_s19, 256  ;;  %p621_p10 = scmp.lt.s32.totalorder %s349_s7, %s619_s19 }
  0x50   : > { %470 = vmatpush3.msra.mxu0 %v251_v4  ;;  %p617_p7 = pneg %p616_p11  ;;  %p622_p2 = scmp.lt.s32.totalorder %s620_s30, %s614_s14 }
  0x51   : > { %471 = vmatprep.subr.mxu0 %v688_v0 }
  0x52   : > { %472 = vmatpush3.msra.mxu0 %v250_v5  ;;  %p623_p13 = por %p622_p2, %p621_p10 }
  0x53   : > { %473 = vmatprep.subr.mxu0 %v688_v0 }
  0x54   : > { %474 = vmatpush3.msra.mxu0 %v249_v6  ;;  %p624_p0 = pnand %p623_p13, %p617_p7 }
  0x55   : > { %475 = vmatprep.subr.mxu0 %v688_v0 }
  0x56   : > { %476 = vmatpush3.msra.mxu0 %v248_v7 }
  0x57   : > { %477 = vmatprep.subr.mxu0 %v688_v0 }
  0x58   : > { %478 = vmatpush3.msra.mxu0 %v247_v8 }
  0x59   : > { %479 = vmatprep.subr.mxu0 %v688_v0 }
  0x5a   : > { %480 = vmatpush3.msra.mxu0 %v246_v9 }
  0x5b   : > { %481 = vmatprep.subr.mxu0 %v688_v0 }
  0x5c   : > { %482 = vmatpush3.msra.mxu0 %v245_v10 }
  0x5d   : > { %483 = vmatprep.subr.mxu0 %v688_v0 }
  0x5e   : > { %484 = vmatpush3.msra.mxu0 %v244_v11 }
  0x5f   : > { %485 = vmatprep.subr.mxu0 %v688_v0 }
  0x60   : > { %486 = vmatpush3.msra.mxu0 %v243_v12 }
  0x61   : > { %487 = vmatprep.subr.mxu0 %v688_v0 }
  0x62   : > { %488 = vmatpush3.msra.mxu0 %v242_v13 }
  0x63   : > { %489 = vmatprep.subr.mxu0 %v688_v0 }
  0x64   : > { %490 = vmatpush3.msra.mxu0 %v241_v14 }
  0x65   : > { %491 = vmatprep.subr.mxu0 %v688_v0 }
  0x66   : > { %492 = vmatpush3.msra.mxu0 %v240_v15 }
  0x67   : > { %493 = vmatprep.subr.mxu0 %v688_v0 }
  0x68   : > { %494 = vmatpush3.msra.mxu0 %v239_v18 }
  0x69   : > { %496 = vmatmul.mubr.msk.f32.vlgmr.msra.gmra.mxu0 %vm236_vm1, %v690_v19 }
 0x129   : > { %v328_v21 = vpop.f32.mrf.mxu0 }
 0x12a   : > { %v329_v22 = vadd.f32 %v440_v20, %v328_v21 }
 0x12b   : > { %v497_v23 = vpop.f32.mrf.mxu0 }
 0x12c   : > { %v332_v24 = vmul.f32 0.25, %v329_v22 }
 0x12e   : > { %333 = vst [vmem:[%s227_s29] sm:$0xff] %v332_v24 }
 0x12f   : > { %627 = shalt.err (!%p624_p0)
}
 0x130   : > { %s628_s5 = scalar_lea.hbm %s346_s13, 128  ;;  %s632_s21 = scalar_lea.hbm %s888_s4, 256 }
 0x131   : > { %p629_p5 = scmp.ne.s32.totalorder %s346_s13, %s628_s5  ;;  %p633_p1 = scmp.lt.s32.totalorder %s346_s13, %s888_s4 }
 0x132   : > { %p634_p4 = scmp.lt.s32.totalorder %s632_s21, %s628_s5 }
 0x133   : > { %p630_p9 = pnand %p629_p5, %p904_p3 }
 0x134   : > { %p635_p6 = por %p634_p4, %p633_p1 }
 0x135   : > { %p631_p12 = pneg %p630_p9 }
 0x137   : > { %p636_p8 = pnand %p635_p6, %p631_p12 }
 0x139   : > { %639 = shalt.err (!%p636_p8)
}
 0x13a   : > { %504 = dma.vmem_to_hbm [thread:$0]  (%p904_p3), %s349_s7, 128, %s346_s13, %s335_s11  }
 0x13b PF: > { %s360_s26 = sand.u32 1, %s670_s15   ;;  %p905_p11 = scmp.ne.s32.totalorder %s894_s22, 0 }
 0x13c   : > { %p906_p7 = scmp.ge.s32.totalorder %s682_s18, 2  ;;  %s361_s28 = scalar_lea.sflag [#allocation4], %s360_s26 }
 0x13e   : > { %p515_p10 = pnand %p906_p7, %p905_p11 }
 0x140   : > { %p516_p2 = pneg %p515_p10 }
 0x142   : > { %665 = dma.done.wait (%p516_p2), %s361_s28, 128  }
 0x143   : > { %667 = vsyncadd (%p516_p2), %s361_s28, 4294967168  ;;  %p18_p13 = scmp.ge.s32.totalorder %s771_s27, 4   ;;  %s907_s15 = smov %s674_s16 }
 0x144   : > { %s908_s16 = smov %s678_s17  ;;  %s909_s17 = smov %s788_s9 }
 0x145   : > { %s910_s18 = smov %s771_s27  ;;  %20 = sbr.rel (!%p18_p13) target bundleno = 6 (0x6), region = 85 }
 0x14a   :  { %366 = vsyncpa [#allocation3], 1 }
 0x14b   :  { %368 = vsyncpa [#allocation3 + $0x1], 1 }
 0x14c   :  { %369 = vsyncpa [#allocation6], 1 }
 0x14d   :  { %370 = vsyncpa [#allocation4], 1 }
 0x14e   :  { %372 = vsyncpa [#allocation4 + $0x1], 1 }

// kernel: tpu_custom_call.1
= control target key start
LH: loop header
LB: loop body
LE: loop exit
PB: predicated region body
PF: predicated region fallthrough
CT: control target
= control target key end

     0   :  { %9 = vsyncpa [#allocation3], 0  ;;  %s884_s0 = inlined_call_operand.hbm [shape: f32[16,128], index: 0, kind: input, shape index: {}]   ;;  %s885_s1 = inlined_call_operand.vmem [shape: f32[1,128], index: 1, kind: input, shape index: {}]   ;;  %s886_s2 = inlined_call_operand.hbm [shape: f32[128,128], index: 2, kind: input, shape index: {}]   ;;  %s887_s3 = inlined_call_operand.vmem [shape: f32[1,128], index: 3, kind: input, shape index: {}]   ;;  %s888_s4 = inlined_call_operand.hbm [shape: f32[16,128], index: 4, kind: output, shape index: {}]  }
   0x1   :  { %11 = vsyncpa [#allocation3 + $0x1], 0 }
   0x2   :  { %12 = vsyncpa [#allocation6], 0 }
   0x3   :  { %13 = vsyncpa [#allocation4], 0 }
   0x4   :  { %15 = vsyncpa [#allocation4 + $0x1], 0  ;;  %s717_s15 = smov 0   ;;  %s719_s16 = smov 0  }
   0x5   :  { %s721_s17 = smov 0   ;;  %s723_s18 = smov 0  }
   0x6 LB: > { %s738_s19 = sadd.s32 4294967295, %s682_s18   ;;  %s428_s20 = sadd.s32 4294967294, %s682_s18   ;;  %s682_s18 = sphi %s723_s18, %s910_s18   ;;  %s678_s17 = sphi %s721_s17, %s909_s17   ;;  %s674_s16 = sphi %s719_s16, %s908_s16   ;;  %s670_s15 = sphi %s717_s15, %s907_s15  }
   0x7   : > { %p41_p0 = scmp.ne.s32.totalorder %s674_s16, %s670_s15  ;;  %p889_p1 = scmp.eq.s32.totalorder %s738_s19, 0 }
   0x8   : > { %p134_p3 = scmp.eq.s32.totalorder %s428_s20, 1  ;;  %p429_p5 = scmp.ge.s32.totalorder %s682_s18, 1 }
   0x9   : > { %p747_p4 = por %p889_p1, %p41_p0  ;;  %p141_p7 = scmp.lt.s32.totalorder %s682_s18, 3 }
   0xa   : > { %p752_p6 = por %p134_p3, %p41_p0  ;;  %s684_s24 = smov [#allocation5]  }
   0xb   : > { %s893_s21 = scalar_select %p747_p4, 1, 0 }
   0xc   : > { %s894_s22 = scalar_select %p752_p6, 1, 0 }
   0xd   : > { %p757_p8 = pnand %p429_p5, %p141_p7  ;;  %s156_s25 = sshll.u32 %s684_s24, 4  ;;  %s157_s25 = int_to_ptr.vmem [resolvable:$true] %s156_s25 }
   0xe   : > { %s771_s27 = sadd.s32 1, %s682_s18   ;;  %s28_s28 = sadd.s32 1, %s678_s17 }
   0xf   : > { %s895_s23 = scalar_select %p757_p8, 1, 0 }
  0x10   : > { %p506_p9 = pneg %p757_p8  ;;  %s25_s29 = ssub.s32 %s682_s18, %s771_s27 }
  0x11   : > { %s571_s30 = scalar_lea.vmem %s157_s25, 2048  ;;  %p579_p5 = scmp.lt.s32.totalorder %s157_s25, %s157_s25 }
  0x12   : > { %p766_p11 = pnand %p506_p9, %p889_p1  ;;  %p572_p13 = scmp.ne.s32.totalorder %s157_s25, %s571_s30 }
  0x13   : > { %p580_p7 = scmp.lt.s32.totalorder %s571_s30, %s571_s30 }
  0x14   : > { %p562_p12 = pneg %p766_p11 }
  0x15   : > { %p581_p10 = por %p580_p7, %p579_p5 }
  0x16   : > { %p574_p0 = pnand %p572_p13, %p562_p12 }
  0x18   : > { %p575_p3 = pneg %p574_p0 }
  0x1a   : > { %p582_p2 = pnand %p581_p10, %p575_p3 }
  0x1c   : > { %585 = shalt.err (!%p582_p2)
}
  0x1d   : > { %s685_s5 = smov 128   ;;  %s686_s6 = smov 8  }
  0x1e   : > { %509 = dma.hbm_to_vmem [thread:$0]  (!%p766_p11), %s886_s2, 2048, %s157_s25, [#allocation6], %s685_s5, %s685_s5, %s686_s6  }
  0x1f   : > { %p26_p9 = scmp.eq.s32.totalorder %s25_s29, 0  ;;  %p35_p12 = scmp.ne.s32.totalorder %s678_s17, %s674_s16 }
  0x20   : > { %p36_p10 = scmp.eq.s32.totalorder %s682_s18, 0  ;;  %p519_p2 = scmp.lt.s32.totalorder %s682_s18, 2 }
  0x21   : > { %s788_s9 = scalar_select %p26_p9, %s678_s17, %s28_s28  }
  0x22   : > { %p37_p13 = por %p36_p10, %p35_p12  ;;  %p897_p0 = scmp.eq.s32.totalorder %s738_s19, 1 }
  0x23   : > { %s173_s11 = sand.u32 1, %s678_s17   ;;  %s433_s12 = sshll.u32 %s682_s18, 7 }
  0x24   : > { %p792_p3 = por %p897_p0, %p35_p12  ;;  %s432_s13 = sshll.u32 %s173_s11, 3 }
  0x25   : > { %s801_s24 = scalar_lea.hbm %s884_s0, %s433_s12  ;;  %s177_s25 = scalar_lea.vmem [#allocation2], %s432_s13 }
  0x26   : > { %s898_s10 = scalar_select %p792_p3, 1, 0 }
  0x27   : > { %s184_s26 = sshll.u32 %s177_s25, 4  ;;  %p803_p11 = pnand %p519_p2, %p37_p13  ;;  %s185_s26 = int_to_ptr.vmem [resolvable:$true] %s184_s26 }
  0x28   : > { %s174_s29 = scalar_lea.sflag [#allocation3], %s173_s11  ;;  %s586_s30 = scalar_lea.hbm %s801_s24, 128 }
  0x29   : > { %p587_p5 = scmp.ne.s32.totalorder %s801_s24, %s586_s30  ;;  %p588_p7 = pneg %p803_p11 }
  0x2a   : > { %s591_s7 = scalar_lea.hbm %s884_s0, 256  ;;  %p592_p10 = scmp.lt.s32.totalorder %s801_s24, %s884_s0 }
  0x2b   : > { %p589_p9 = pnand %p588_p7, %p587_p5  ;;  %p593_p2 = scmp.lt.s32.totalorder %s591_s7, %s586_s30 }
  0x2d   : > { %p590_p12 = pneg %p589_p9  ;;  %p594_p13 = por %p593_p2, %p592_p10 }
  0x2f   : > { %p595_p0 = pnand %p594_p13, %p590_p12 }
  0x31   : > { %598 = shalt.err (!%p595_p0)
}
  0x32   : > { %s599_s13 = scalar_lea.vmem %s185_s26, 128  ;;  %s687_s11 = smov [#allocation2]  }
  0x33   : > { %p600_p1 = scmp.ne.s32.totalorder %s185_s26, %s599_s13  ;;  %s604_s14 = sshll.u32 %s687_s11, 4  ;;  %s605_s14 = int_to_ptr.vmem [resolvable:$false] %s604_s14 }
  0x34   : > { %s606_s20 = scalar_lea.vmem %s605_s14, 256  ;;  %p607_p5 = scmp.lt.s32.totalorder %s185_s26, %s605_s14 }
  0x35   : > { %p602_p6 = pnand %p600_p1, %p588_p7  ;;  %p608_p9 = scmp.lt.s32.totalorder %s606_s20, %s599_s13 }
  0x37   : > { %p603_p3 = pneg %p602_p6  ;;  %p609_p4 = por %p608_p9, %p607_p5 }
  0x39   : > { %p610_p8 = pnand %p609_p4, %p603_p3 }
  0x3b   : > { %613 = shalt.err (!%p610_p8)
}
  0x3c   : > { %513 = dma.hbm_to_vmem [thread:$0]  (!%p803_p11), %s801_s24, 128, %s185_s26, %s174_s29  }
  0x3d   : > { %p900_p12 = scmp.ne.s32.totalorder %s895_s23, 0 }
  0x3e   : > { %s824_s25 = sand.u32 (!%p900_p12), 1, %s674_s16   ;;  %p901_p1 = scmp.ne.s32.totalorder (!%p900_p12), %s893_s21, 0 }
  0x3f   : > { %193 = sbr.rel (%p900_p12) target bundleno = 315 (0x13b), region = 36  ;;  %s435_s30 = sshll.u32 (!%p900_p12), %s824_s25, 3 }
  0x40   : > { %s196_s5 = scalar_lea.sflag (!%p900_p12), [#allocation3], %s824_s25  ;;  %s830_s6 = scalar_lea.vmem (!%p900_p12), [#allocation2], %s435_s30 }
  0x44   : > { %657 = dma.done.wait (%p901_p1), %s196_s5, 128  }
  0x45   : > { %659 = vsyncadd (%p901_p1), %s196_s5, 4294967168  ;;  %p902_p4 = scmp.eq.s32.totalorder %s738_s19, 0 }
  0x47   : > { %661 = dma.done.wait (%p902_p4), [#allocation6], 2048   ;;  %p903_p6 = pmov %p902_p4 }
  0x48   : > { %v688_v0 = vmov 0.0   ;;  %vm689_vm0 = vmmov 0   ;;  %v254_v1 = vld [vmem:[#allocation5 + $0x78] sm:$0xff]  ;;  %v253_v2 = vld [vmem:[#allocation5 + $0x70] sm:$0xff]  ;;  %v252_v3 = vld [vmem:[#allocation5 + $0x68] sm:$0xff]  ;;  %v690_v19 = vmov 1.0  }
  0x49   : > { %663 = vsyncadd (%p903_p6), [#allocation6], 4294965248  ;;  %463 = vmatprep.subr.mxu0 %v688_v0  ;;  %495 = vmatprep.mubr.msk.f32.mxu0 %vm689_vm0, %v688_v0  ;;  %v251_v4 = vld [vmem:[#allocation5 + $0x60] sm:$0xff]  ;;  %v250_v5 = vld [vmem:[#allocation5 + $0x58] sm:$0xff]  ;;  %s443_s28 = sshll.u32 %s738_s19, 7  ;;  %s227_s29 = scalar_lea.vmem [#allocation7], %s435_s30 }
  0x4a   : > { %464 = vmatpush3.msra.mxu0 %v254_v1  ;;  %v249_v6 = vld [vmem:[#allocation5 + $0x50] sm:$0xff]  ;;  %v248_v7 = vld [vmem:[#allocation5 + $0x48] sm:$0xff]  ;;  %v247_v8 = vld [vmem:[#allocation5 + $0x40] sm:$0xff]  ;;  %s348_s7 = sshll.u32 %s227_s29, 4  ;;  %s346_s13 = scalar_lea.hbm %s888_s4, %s443_s28  ;;  %s349_s7 = int_to_ptr.vmem [resolvable:$true] %s348_s7 }
  0x4b   : > { %465 = vmatprep.subr.mxu0 %v688_v0  ;;  %v246_v9 = vld [vmem:[#allocation5 + $0x38] sm:$0xff]  ;;  %v245_v10 = vld [vmem:[#allocation5 + $0x30] sm:$0xff]  ;;  %v244_v11 = vld [vmem:[#allocation5 + $0x28] sm:$0xff]  ;;  %s335_s11 = scalar_lea.sflag [#allocation4], %s824_s25  ;;  %s614_s14 = scalar_lea.vmem %s349_s7, 128 }
  0x4c   : > { %466 = vmatpush3.msra.mxu0 %v253_v2  ;;  %v243_v12 = vld [vmem:[#allocation5 + $0x20] sm:$0xff]  ;;  %v242_v13 = vld [vmem:[#allocation5 + $0x18] sm:$0xff]  ;;  %v241_v14 = vld [vmem:[#allocation5 + $0x10] sm:$0xff]  ;;  %p615_p8 = scmp.ne.s32.totalorder %s349_s7, %s614_s14  ;;  %p904_p3 = scmp.ne.s32.totalorder %s898_s10, 0 }
  0x4d   : > { %467 = vmatprep.subr.mxu0 %v688_v0  ;;  %v240_v15 = vld [vmem:[#allocation5 + $0x8] sm:$0xff]  ;;  %v438_v16 = vld [vmem:[%s885_s1] ss:$0 sm:$0xff]  ;;  %v239_v18 = vld [vmem:[#allocation5] sm:$0xff]  ;;  %s691_s20 = smov [#allocation7]  }
  0x4e   : > { %468 = vmatpush3.msra.mxu0 %v252_v3  ;;  %v229_v17 = vld [vmem:[%s830_s6] sm:$0xff]  ;;  %p616_p11 = pnand %p615_p8, %p904_p3  ;;  %s618_s19 = sshll.u32 %s691_s20, 4  ;;  %s619_s19 = int_to_ptr.vmem [resolvable:$false] %s618_s19 }
  0x4f   : > { %469 = vmatprep.subr.mxu0 %v688_v0  ;;  %vm236_vm1 = vcmp.lt.f32.partialorder %v438_v16, %v229_v17  ;;  %v440_v20 = vld [vmem:[%s887_s3] ss:$0 sm:$0xff]  ;;  %s620_s30 = scalar_lea.vmem %s619_s19, 256  ;;  %p621_p10 = scmp.lt.s32.totalorder %s349_s7, %s619_s19 }
  0x50   : > { %470 = vmatpush3.msra.mxu0 %v251_v4  ;;  %p617_p7 = pneg %p616_p11  ;;  %p622_p2 = scmp.lt.s32.totalorder %s620_s30, %s614_s14 }
  0x51   : > { %471 = vmatprep.subr.mxu0 %v688_v0 }
  0x52   : > { %472 = vmatpush3.msra.mxu0 %v250_v5  ;;  %p623_p13 = por %p622_p2, %p621_p10 }
  0x53   : > { %473 = vmatprep.subr.mxu0 %v688_v0 }
  0x54   : > { %474 = vmatpush3.msra.mxu0 %v249_v6  ;;  %p624_p0 = pnand %p623_p13, %p617_p7 }
  0x55   : > { %475 = vmatprep.subr.mxu0 %v688_v0 }
  0x56   : > { %476 = vmatpush3.msra.mxu0 %v248_v7 }
  0x57   : > { %477 = vmatprep.subr.mxu0 %v688_v0 }
  0x58   : > { %478 = vmatpush3.msra.mxu0 %v247_v8 }
  0x59   : > { %479 = vmatprep.subr.mxu0 %v688_v0 }
  0x5a   : > { %480 = vmatpush3.msra.mxu0 %v246_v9 }
  0x5b   : > { %481 = vmatprep.subr.mxu0 %v688_v0 }
  0x5c   : > { %482 = vmatpush3.msra.mxu0 %v245_v10 }
  0x5d   : > { %483 = vmatprep.subr.mxu0 %v688_v0 }
  0x5e   : > { %484 = vmatpush3.msra.mxu0 %v244_v11 }
  0x5f   : > { %485 = vmatprep.subr.mxu0 %v688_v0 }
  0x60   : > { %486 = vmatpush3.msra.mxu0 %v243_v12 }
  0x61   : > { %487 = vmatprep.subr.mxu0 %v688_v0 }
  0x62   : > { %488 = vmatpush3.msra.mxu0 %v242_v13 }
  0x63   : > { %489 = vmatprep.subr.mxu0 %v688_v0 }
  0x64   : > { %490 = vmatpush3.msra.mxu0 %v241_v14 }
  0x65   : > { %491 = vmatprep.subr.mxu0 %v688_v0 }
  0x66   : > { %492 = vmatpush3.msra.mxu0 %v240_v15 }
  0x67   : > { %493 = vmatprep.subr.mxu0 %v688_v0 }
  0x68   : > { %494 = vmatpush3.msra.mxu0 %v239_v18 }
  0x69   : > { %496 = vmatmul.mubr.msk.f32.vlgmr.msra.gmra.mxu0 %vm236_vm1, %v690_v19 }
 0x129   : > { %v328_v21 = vpop.f32.mrf.mxu0 }
 0x12a   : > { %v329_v22 = vadd.f32 %v440_v20, %v328_v21 }
 0x12b   : > { %v497_v23 = vpop.f32.mrf.mxu0 }
 0x12c   : > { %v332_v24 = vmul.f32 0.25, %v329_v22 }
 0x12e   : > { %333 = vst [vmem:[%s227_s29] sm:$0xff] %v332_v24 }
 0x12f   : > { %627 = shalt.err (!%p624_p0)
}
 0x130   : > { %s628_s5 = scalar_lea.hbm %s346_s13, 128  ;;  %s632_s21 = scalar_lea.hbm %s888_s4, 256 }
 0x131   : > { %p629_p5 = scmp.ne.s32.totalorder %s346_s13, %s628_s5  ;;  %p633_p1 = scmp.lt.s32.totalorder %s346_s13, %s888_s4 }
 0x132   : > { %p634_p4 = scmp.lt.s32.totalorder %s632_s21, %s628_s5 }
 0x133   : > { %p630_p9 = pnand %p629_p5, %p904_p3 }
 0x134   : > { %p635_p6 = por %p634_p4, %p633_p1 }
 0x135   : > { %p631_p12 = pneg %p630_p9 }
 0x137   : > { %p636_p8 = pnand %p635_p6, %p631_p12 }
 0x139   : > { %639 = shalt.err (!%p636_p8)
}
 0x13a   : > { %504 = dma.vmem_to_hbm [thread:$0]  (%p904_p3), %s349_s7, 128, %s346_s13, %s335_s11  }
 0x13b PF: > { %s360_s26 = sand.u32 1, %s670_s15   ;;  %p905_p11 = scmp.ne.s32.totalorder %s894_s22, 0 }
 0x13c   : > { %p906_p7 = scmp.ge.s32.totalorder %s682_s18, 2  ;;  %s361_s28 = scalar_lea.sflag [#allocation4], %s360_s26 }
 0x13e   : > { %p515_p10 = pnand %p906_p7, %p905_p11 }
 0x140   : > { %p516_p2 = pneg %p515_p10 }
 0x142   : > { %665 = dma.done.wait (%p516_p2), %s361_s28, 128  }
 0x143   : > { %667 = vsyncadd (%p516_p2), %s361_s28, 4294967168  ;;  %p18_p13 = scmp.ge.s32.totalorder %s771_s27, 4   ;;  %s907_s15 = smov %s674_s16 }
 0x144   : > { %s908_s16 = smov %s678_s17  ;;  %s909_s17 = smov %s788_s9 }
 0x145   : > { %s910_s18 = smov %s771_s27  ;;  %20 = sbr.rel (!%p18_p13) target bundleno = 6 (0x6), region = 85 }
 0x14a   :  { %366 = vsyncpa [#allocation3], 1 }
 0x14b   :  { %368 = vsyncpa [#allocation3 + $0x1], 1 }
 0x14c   :  { %369 = vsyncpa [#allocation6], 1 }
 0x14d   :  { %370 = vsyncpa [#allocation4], 1 }
 0x14e   :  { %372 = vsyncpa [#allocation4 + $0x1], 1 }

</bundles_post_ra>
